<compile_context>
chip_gen: v7x
topology: tpu7x:2x2x1
jax: 0.10.0
libtpu: 0.0.40
codegen_flags: <defaults>
</compile_context>

<pallas_src>
import functools
import math

import jax
import jax.numpy as jnp
from jax.experimental import pallas as pl
from jax.experimental.pallas import tpu as pltpu


# ----------------------------------------------------------------------------
# Kernel
# ----------------------------------------------------------------------------
def mha_kernel(x_ref, wqkv_ref, bqkv_ref, wo_ref, bo_ref, o_ref, attn_ref, *,
               n_head: int, hidden: int, b_blk: int, seq: int,
               attn_bf16: bool):
    d_in = x_ref.shape[-1]
    d_pad = wo_ref.shape[-1]
    HN = n_head * hidden
    rows = b_blk * seq

    # Flatten the batch-chunk: one projection matmul over all rows.
    x = x_ref[...].reshape(rows, d_in)                               # [R, D]

    # Fused Q|K|V projection (single MXU dot, f32 accumulate).
    # Columns [0:HN] are Q (1/sqrt(hidden) pre-folded), [HN:2HN] K, [2HN:3HN] V.
    qkv = jnp.dot(x, wqkv_ref[...],
                  preferred_element_type=jnp.float32) + bqkv_ref[...]
    qkv = qkv.reshape(b_blk, seq, 3 * HN)                            # [b, S, 3HN]

    mm_dt = jnp.bfloat16 if attn_bf16 else jnp.float32

    # Static unroll over heads; each iteration batched over the batch-chunk.
    for h in range(n_head):
        lo = h * hidden
        qh = qkv[:, :, lo:lo + hidden].astype(mm_dt)                 # [b, S, H]
        kh = qkv[:, :, HN + lo:HN + lo + hidden].astype(mm_dt)
        vh = qkv[:, :, 2 * HN + lo:2 * HN + lo + hidden]

        # Scores: contract last dims (no kh.T / XLU transpose). Scale already
        # folded into the Q weights.
        s = jnp.einsum("bqd,bkd->bqk", qh, kh,
                       preferred_element_type=jnp.float32)           # [b, S, S]
        s = s - jnp.max(s, axis=-1, keepdims=True)
        p = jnp.exp(s)
        p = p / jnp.sum(p, axis=-1, keepdims=True)                   # exact f32

        oh = jnp.einsum("bqk,bkd->bqd", p.astype(mm_dt), vh.astype(mm_dt),
                        preferred_element_type=jnp.float32)          # [b, S, H]

        # Stash this head's output into the concat-layout scratch.
        attn_ref[:, lo:lo + hidden] = oh.reshape(rows, hidden)

    # Single fused output projection: [rows, HN] @ [HN, d_pad] + bias.
    out = jnp.dot(attn_ref[...], wo_ref[...],
                  preferred_element_type=jnp.float32) + bo_ref[...]  # [R, Dp]
    o_ref[...] = out.reshape(b_blk, seq, d_pad).astype(o_ref.dtype)


# ----------------------------------------------------------------------------
# Host-side parameter transform
# ----------------------------------------------------------------------------
def prepare_params(params, *, hidden: int, d_pad: int = 128):
    """One-time host-side transform:
       - fold 1/sqrt(hidden) into Wq / bq,
       - fuse Q|K|V weights/biases into a single [D, 3*HN] / [1, 3*HN] pair,
       - zero-pad Wo / bo along the output dim to a lane-dense width."""
    scale = 1.0 / math.sqrt(hidden)
    wqkv = jnp.concatenate(
        [params["wq"] * scale, params["wk"], params["wv"]], axis=1)
    bqkv = jnp.concatenate(
        [params["bq"] * scale, params["bk"], params["bv"]], axis=1)
    wo, bo = params["wo"], params["bo"]
    pad = d_pad - wo.shape[-1]
    assert pad >= 0
    return {
        "wqkv": wqkv, "bqkv": bqkv,
        "wo": jnp.pad(wo, ((0, 0), (0, pad))),
        "bo": jnp.pad(bo, ((0, 0), (0, pad))),
    }


# ----------------------------------------------------------------------------
# Wrapper / tiling heuristics
# ----------------------------------------------------------------------------
def _num_tensorcores() -> int:
    """v7x packs 2 TensorCores per chip; v5e/v6e have 1."""
    try:
        kind = (getattr(jax.devices()[0], "device_kind", "") or "").lower()
        return 2 if "v7" in kind else 1
    except Exception:
        return 1


def _step_vmem_bytes(b_blk: int, S: int, D: int, HN: int, d_pad: int) -> int:
    """Rough per-grid-step VMEM footprint (f32, double-buffered I/O blocks)."""
    rows = b_blk * S
    f32 = 4
    io = 2 * (b_blk * S * D + b_blk * S * d_pad) * f32
    weights = (D * 3 * HN + 3 * HN + HN * d_pad + d_pad) * f32
    inter = (rows * 3 * HN + b_blk * S * S + rows * HN + rows * d_pad) * f32
    return io + weights + inter + (1 << 20)       # +1 MiB slack


def _pick_b_blk(B: int, S: int, D: int, HN: int, d_pad: int,
                n_tc: int, budget: int) -> int:
    # Start from B (single step) on 1-TC parts, B//n_tc on v7x so the
    # "parallel" grid axis actually shards across both TensorCores.
    start = B // n_tc if (n_tc > 1 and B % n_tc == 0 and B >= n_tc) else B
    best = 1
    for d in range(1, B + 1):                     # divisors of B, ascending
        if B % d != 0 or d > start:
            continue
        if _step_vmem_bytes(d, S, D, HN, d_pad) <= budget:
            best = d
    return best


def multi_head_attention(x, kparams, *, n_head: int, hidden: int,
                         d_pad: int = 128, b_blk: int | None = None,
                         attn_bf16: bool = False, slice_output: bool = True,
                         vmem_budget_bytes: int = 24 << 20):
    """x: [B, S, D] float32.  kparams: output of prepare_params()."""
    B, S, D = x.shape
    HN = n_head * hidden
    if b_blk is None:
        b_blk = _pick_b_blk(B, S, D, HN, d_pad, _num_tensorcores(),
                            vmem_budget_bytes)
    assert B % b_blk == 0
    nb = B // b_blk

    kernel = functools.partial(mha_kernel, n_head=n_head, hidden=hidden,
                               b_blk=b_blk, seq=S, attn_bf16=attn_bf16)

    def full(shape):
        return pl.BlockSpec(shape, lambda b: (0,) * len(shape))

    out_pad = pl.pallas_call(
        kernel,
        out_shape=jax.ShapeDtypeStruct((B, S, d_pad), x.dtype),
        grid_spec=pltpu.PrefetchScalarGridSpec(
            num_scalar_prefetch=0,
            grid=(nb,),
            in_specs=[
                pl.BlockSpec((b_blk, S, D), lambda b: (b, 0, 0)),    # x
                full((D, 3 * HN)), full((1, 3 * HN)),                # W_qkv, b_qkv
                full((HN, d_pad)), full((1, d_pad)),                 # Wo, bo (padded)
            ],
            out_specs=pl.BlockSpec((b_blk, S, d_pad), lambda b: (b, 0, 0)),
            scratch_shapes=[pltpu.VMEM((b_blk * S, HN), jnp.float32)],
        ),
        compiler_params=pltpu.CompilerParams(
            dimension_semantics=("parallel",),
            vmem_limit_bytes=32 << 20),
    )(x, kparams["wqkv"], kparams["bqkv"], kparams["wo"], kparams["bo"])

    # Drop the zero-padded lanes (layout plumbing only); skip if the consumer
    # accepts the [B, S, d_pad] padded layout.
    return out_pad[..., :D] if slice_output else out_pad


# ----------------------------------------------------------------------------
# Parameters + pure-JAX reference
# ----------------------------------------------------------------------------
def init_params(key, dim, hidden, n_head):
    """Deterministic synthetic parameters. Weights stored as [in, out]."""
    HN = hidden * n_head
    ks = jax.random.split(key, 8)
    sc_in = 1.0 / math.sqrt(dim)
    sc_hn = 1.0 / math.sqrt(HN)
    return {
        "wq": jax.random.uniform(ks[0], (dim, HN), jnp.float32, -sc_in, sc_in),
        "bq": jax.random.uniform(ks[1], (1, HN), jnp.float32, -sc_in, sc_in),
        "wk": jax.random.uniform(ks[2], (dim, HN), jnp.float32, -sc_in, sc_in),
        "bk": jax.random.uniform(ks[3], (1, HN), jnp.float32, -sc_in, sc_in),
        "wv": jax.random.uniform(ks[4], (dim, HN), jnp.float32, -sc_in, sc_in),
        "bv": jax.random.uniform(ks[5], (1, HN), jnp.float32, -sc_in, sc_in),
        "wo": jax.random.uniform(ks[6], (HN, dim), jnp.float32, -sc_hn, sc_hn),
        "bo": jax.random.uniform(ks[7], (1, dim), jnp.float32, -sc_hn, sc_hn),
    }


def reference_mha(x, params, *, n_head, hidden):
    """Pure-JAX reference mirroring the PyTorch forward (uses RAW params)."""
    B, S, D = x.shape
    HN = n_head * hidden
    q = (x @ params["wq"] + params["bq"]).reshape(B, S, n_head, hidden).transpose(0, 2, 1, 3)
    k = (x @ params["wk"] + params["bk"]).reshape(B, S, n_head, hidden).transpose(0, 2, 1, 3)
    v = (x @ params["wv"] + params["bv"]).reshape(B, S, n_head, hidden).transpose(0, 2, 1, 3)
    score = jnp.einsum("bhqd,bhkd->bhqk", q, k) / math.sqrt(hidden)
    p = jax.nn.softmax(score, axis=-1)
    attn = jnp.einsum("bhqk,bhkd->bhqd", p, v)
    attn = attn.transpose(0, 2, 1, 3).reshape(B, S, HN)
    return attn @ params["wo"] + params["bo"]


if __name__ == "__main__":
    # Small shapes consistent with the module: dim=32, hidden_size=16, n_head=6
    B, S, D = 2, 8, 32
    HIDDEN, N_HEAD = 16, 6

    key = jax.random.PRNGKey(0)
    kx, kp = jax.random.split(key)
    x = jax.random.normal(kx, (B, S, D), dtype=jnp.float32)
    params = init_params(kp, D, HIDDEN, N_HEAD)

    # One-time host-side transform (scale folding + QKV fusion + lane padding).
    kparams = prepare_params(params, hidden=HIDDEN, d_pad=128)

    out = multi_head_attention(x, kparams, n_head=N_HEAD, hidden=HIDDEN)
    out = jax.block_until_ready(out)

    ref = reference_mha(x, params, n_head=N_HEAD, hidden=HIDDEN)
    assert out.shape == (B, S, D)
    # Exact f32 softmax + exact scale folding -> tight tolerance restored.
    assert jnp.allclose(out, ref, atol=1e-4, rtol=1e-4), "mismatch vs reference"

    print("KERNEL_OK")
</pallas_src>

<mosaic_0001>
module attributes {stable_mosaic.version = 11 : i64} {
  func.func @mha_kernel(%arg0: i32, %arg1: memref<2x8x32xf32, #tpu.memory_space<vmem>>, %arg2: memref<32x288xf32, #tpu.memory_space<vmem>>, %arg3: memref<1x288xf32, #tpu.memory_space<vmem>>, %arg4: memref<96x128xf32, #tpu.memory_space<vmem>>, %arg5: memref<1x128xf32, #tpu.memory_space<vmem>>, %arg6: memref<2x8x128xf32, #tpu.memory_space<vmem>>, %arg7: memref<16x96xf32, #tpu.memory_space<vmem>>) attributes {dimension_semantics = [#tpu.dimension_semantics<parallel>], iteration_bounds = array<i64: 1>, scalar_prefetch = 0 : i64, scratch_operands = 1 : i64, tpu.core_type = #tpu.core_type<tc>, window_params = [{transform_indices = @transform_0, window_bounds = array<i64: 2, 8, 32>}, {pipeline_mode = #tpu.pipeline_mode<synchronous>, transform_indices = @transform_1, window_bounds = array<i64: 32, 288>}, {pipeline_mode = #tpu.pipeline_mode<synchronous>, transform_indices = @transform_2, window_bounds = array<i64: 1, 288>}, {pipeline_mode = #tpu.pipeline_mode<synchronous>, transform_indices = @transform_3, window_bounds = array<i64: 96, 128>}, {pipeline_mode = #tpu.pipeline_mode<synchronous>, transform_indices = @transform_4, window_bounds = array<i64: 1, 128>}, {transform_indices = @transform_5, window_bounds = array<i64: 2, 8, 128>}]} {
    %c0 = arith.constant 0 : index
    %c0_0 = arith.constant 0 : index
    %c0_1 = arith.constant 0 : index
    %0 = vector.load %arg1[%c0, %c0_0, %c0_1] : memref<2x8x32xf32, #tpu.memory_space<vmem>>, vector<2x8x32xf32>
    %1 = vector.shape_cast %0 : vector<2x8x32xf32> to vector<16x32xf32>
    %c0_2 = arith.constant 0 : index
    %c0_3 = arith.constant 0 : index
    %2 = vector.load %arg2[%c0_2, %c0_3] : memref<32x288xf32, #tpu.memory_space<vmem>>, vector<32x288xf32>
    %cst = arith.constant dense<0.000000e+00> : vector<16x288xf32>
    %3 = tpu.matmul %1, %2, %cst {dimension_numbers = #tpu.dot_dimension_numbers<[1], [0], [0], [1], [0, 0, 1, 1], [], []>} : vector<16x32xf32>, vector<32x288xf32>, vector<16x288xf32> -> vector<16x288xf32>
    %c0_4 = arith.constant 0 : index
    %c0_5 = arith.constant 0 : index
    %4 = vector.load %arg3[%c0_4, %c0_5] : memref<1x288xf32, #tpu.memory_space<vmem>>, vector<1x288xf32>
    %5 = vector.broadcast %4 : vector<1x288xf32> to vector<16x288xf32>
    %6 = arith.addf %3, %5 : vector<16x288xf32>
    %7 = vector.shape_cast %6 : vector<16x288xf32> to vector<2x8x288xf32>
    %8 = vector.extract_strided_slice %7 {offsets = [0, 0, 0], sizes = [2, 8, 16], strides = [1, 1, 1]} : vector<2x8x288xf32> to vector<2x8x16xf32>
    %9 = vector.extract_strided_slice %7 {offsets = [0, 0, 96], sizes = [2, 8, 16], strides = [1, 1, 1]} : vector<2x8x288xf32> to vector<2x8x16xf32>
    %10 = vector.extract_strided_slice %7 {offsets = [0, 0, 192], sizes = [2, 8, 16], strides = [1, 1, 1]} : vector<2x8x288xf32> to vector<2x8x16xf32>
    "tpu.trace_start"() <{level = 10 : i32, message = "bqd,bkd->bqk"}> : () -> ()
    %cst_6 = arith.constant dense<0.000000e+00> : vector<2x8x8xf32>
    %11 = tpu.matmul %8, %9, %cst_6 {dimension_numbers = #tpu.dot_dimension_numbers<[2], [2], [1], [1], [0, 0, 0, 1, 1, 1], [0], [0]>} : vector<2x8x16xf32>, vector<2x8x16xf32>, vector<2x8x8xf32> -> vector<2x8x8xf32>
    "tpu.trace_stop"() : () -> ()
    %cst_7 = arith.constant dense<0xFF800000> : vector<2x8xf32>
    %12 = vector.multi_reduction <maximumf>, %11, %cst_7 [2] : vector<2x8x8xf32> to vector<2x8xf32>
    %13 = vector.shape_cast %12 : vector<2x8xf32> to vector<2x8x1xf32>
    %14 = vector.broadcast %13 : vector<2x8x1xf32> to vector<2x8x8xf32>
    %15 = arith.subf %11, %14 : vector<2x8x8xf32>
    %16 = math.exp %15 : vector<2x8x8xf32>
    %cst_8 = arith.constant dense<0.000000e+00> : vector<2x8xf32>
    %17 = vector.multi_reduction <add>, %16, %cst_8 [2] : vector<2x8x8xf32> to vector<2x8xf32>
    %18 = vector.shape_cast %17 : vector<2x8xf32> to vector<2x8x1xf32>
    %19 = vector.broadcast %18 : vector<2x8x1xf32> to vector<2x8x8xf32>
    %20 = arith.divf %16, %19 : vector<2x8x8xf32>
    "tpu.trace_start"() <{level = 10 : i32, message = "bqk,bkd->bqd"}> : () -> ()
    %cst_9 = arith.constant dense<0.000000e+00> : vector<2x8x16xf32>
    %21 = tpu.matmul %20, %10, %cst_9 {dimension_numbers = #tpu.dot_dimension_numbers<[2], [1], [1], [2], [0, 0, 0, 1, 1, 2], [0], [0]>} : vector<2x8x8xf32>, vector<2x8x16xf32>, vector<2x8x16xf32> -> vector<2x8x16xf32>
    "tpu.trace_stop"() : () -> ()
    %22 = vector.shape_cast %21 : vector<2x8x16xf32> to vector<16x16xf32>
    %c0_10 = arith.constant 0 : index
    %c0_11 = arith.constant 0 : index
    %23 = vector.load %arg7[%c0_10, %c0_11] : memref<16x96xf32, #tpu.memory_space<vmem>>, vector<16x16xf32>
    tpu.vector_store %arg7[%c0_10, %c0_11], %22 {strides = array<i32>} : memref<16x96xf32, #tpu.memory_space<vmem>>, vector<16x16xf32>,
    %24 = vector.extract_strided_slice %7 {offsets = [0, 0, 16], sizes = [2, 8, 16], strides = [1, 1, 1]} : vector<2x8x288xf32> to vector<2x8x16xf32>
    %25 = vector.extract_strided_slice %7 {offsets = [0, 0, 112], sizes = [2, 8, 16], strides = [1, 1, 1]} : vector<2x8x288xf32> to vector<2x8x16xf32>
    %26 = vector.extract_strided_slice %7 {offsets = [0, 0, 208], sizes = [2, 8, 16], strides = [1, 1, 1]} : vector<2x8x288xf32> to vector<2x8x16xf32>
    "tpu.trace_start"() <{level = 10 : i32, message = "bqd,bkd->bqk"}> : () -> ()
    %cst_12 = arith.constant dense<0.000000e+00> : vector<2x8x8xf32>
    %27 = tpu.matmul %24, %25, %cst_12 {dimension_numbers = #tpu.dot_dimension_numbers<[2], [2], [1], [1], [0, 0, 0, 1, 1, 1], [0], [0]>} : vector<2x8x16xf32>, vector<2x8x16xf32>, vector<2x8x8xf32> -> vector<2x8x8xf32>
    "tpu.trace_stop"() : () -> ()
    %cst_13 = arith.constant dense<0xFF800000> : vector<2x8xf32>
    %28 = vector.multi_reduction <maximumf>, %27, %cst_13 [2] : vector<2x8x8xf32> to vector<2x8xf32>
    %29 = vector.shape_cast %28 : vector<2x8xf32> to vector<2x8x1xf32>
    %30 = vector.broadcast %29 : vector<2x8x1xf32> to vector<2x8x8xf32>
    %31 = arith.subf %27, %30 : vector<2x8x8xf32>
    %32 = math.exp %31 : vector<2x8x8xf32>
    %cst_14 = arith.constant dense<0.000000e+00> : vector<2x8xf32>
    %33 = vector.multi_reduction <add>, %32, %cst_14 [2] : vector<2x8x8xf32> to vector<2x8xf32>
    %34 = vector.shape_cast %33 : vector<2x8xf32> to vector<2x8x1xf32>
    %35 = vector.broadcast %34 : vector<2x8x1xf32> to vector<2x8x8xf32>
    %36 = arith.divf %32, %35 : vector<2x8x8xf32>
    "tpu.trace_start"() <{level = 10 : i32, message = "bqk,bkd->bqd"}> : () -> ()
    %cst_15 = arith.constant dense<0.000000e+00> : vector<2x8x16xf32>
    %37 = tpu.matmul %36, %26, %cst_15 {dimension_numbers = #tpu.dot_dimension_numbers<[2], [1], [1], [2], [0, 0, 0, 1, 1, 2], [0], [0]>} : vector<2x8x8xf32>, vector<2x8x16xf32>, vector<2x8x16xf32> -> vector<2x8x16xf32>
    "tpu.trace_stop"() : () -> ()
    %38 = vector.shape_cast %37 : vector<2x8x16xf32> to vector<16x16xf32>
    %c0_16 = arith.constant 0 : index
    %c16 = arith.constant 16 : index
    %39 = vector.load %arg7[%c0_16, %c16] : memref<16x96xf32, #tpu.memory_space<vmem>>, vector<16x16xf32>
    tpu.vector_store %arg7[%c0_16, %c16], %38 {strides = array<i32>} : memref<16x96xf32, #tpu.memory_space<vmem>>, vector<16x16xf32>,
    %40 = vector.extract_strided_slice %7 {offsets = [0, 0, 32], sizes = [2, 8, 16], strides = [1, 1, 1]} : vector<2x8x288xf32> to vector<2x8x16xf32>
    %41 = vector.extract_strided_slice %7 {offsets = [0, 0, 128], sizes = [2, 8, 16], strides = [1, 1, 1]} : vector<2x8x288xf32> to vector<2x8x16xf32>
    %42 = vector.extract_strided_slice %7 {offsets = [0, 0, 224], sizes = [2, 8, 16], strides = [1, 1, 1]} : vector<2x8x288xf32> to vector<2x8x16xf32>
    "tpu.trace_start"() <{level = 10 : i32, message = "bqd,bkd->bqk"}> : () -> ()
    %cst_17 = arith.constant dense<0.000000e+00> : vector<2x8x8xf32>
    %43 = tpu.matmul %40, %41, %cst_17 {dimension_numbers = #tpu.dot_dimension_numbers<[2], [2], [1], [1], [0, 0, 0, 1, 1, 1], [0], [0]>} : vector<2x8x16xf32>, vector<2x8x16xf32>, vector<2x8x8xf32> -> vector<2x8x8xf32>
    "tpu.trace_stop"() : () -> ()
    %cst_18 = arith.constant dense<0xFF800000> : vector<2x8xf32>
    %44 = vector.multi_reduction <maximumf>, %43, %cst_18 [2] : vector<2x8x8xf32> to vector<2x8xf32>
    %45 = vector.shape_cast %44 : vector<2x8xf32> to vector<2x8x1xf32>
    %46 = vector.broadcast %45 : vector<2x8x1xf32> to vector<2x8x8xf32>
    %47 = arith.subf %43, %46 : vector<2x8x8xf32>
    %48 = math.exp %47 : vector<2x8x8xf32>
    %cst_19 = arith.constant dense<0.000000e+00> : vector<2x8xf32>
    %49 = vector.multi_reduction <add>, %48, %cst_19 [2] : vector<2x8x8xf32> to vector<2x8xf32>
    %50 = vector.shape_cast %49 : vector<2x8xf32> to vector<2x8x1xf32>
    %51 = vector.broadcast %50 : vector<2x8x1xf32> to vector<2x8x8xf32>
    %52 = arith.divf %48, %51 : vector<2x8x8xf32>
    "tpu.trace_start"() <{level = 10 : i32, message = "bqk,bkd->bqd"}> : () -> ()
    %cst_20 = arith.constant dense<0.000000e+00> : vector<2x8x16xf32>
    %53 = tpu.matmul %52, %42, %cst_20 {dimension_numbers = #tpu.dot_dimension_numbers<[2], [1], [1], [2], [0, 0, 0, 1, 1, 2], [0], [0]>} : vector<2x8x8xf32>, vector<2x8x16xf32>, vector<2x8x16xf32> -> vector<2x8x16xf32>
    "tpu.trace_stop"() : () -> ()
    %54 = vector.shape_cast %53 : vector<2x8x16xf32> to vector<16x16xf32>
    %c0_21 = arith.constant 0 : index
    %c32 = arith.constant 32 : index
    %55 = vector.load %arg7[%c0_21, %c32] : memref<16x96xf32, #tpu.memory_space<vmem>>, vector<16x16xf32>
    tpu.vector_store %arg7[%c0_21, %c32], %54 {strides = array<i32>} : memref<16x96xf32, #tpu.memory_space<vmem>>, vector<16x16xf32>,
    %56 = vector.extract_strided_slice %7 {offsets = [0, 0, 48], sizes = [2, 8, 16], strides = [1, 1, 1]} : vector<2x8x288xf32> to vector<2x8x16xf32>
    %57 = vector.extract_strided_slice %7 {offsets = [0, 0, 144], sizes = [2, 8, 16], strides = [1, 1, 1]} : vector<2x8x288xf32> to vector<2x8x16xf32>
    %58 = vector.extract_strided_slice %7 {offsets = [0, 0, 240], sizes = [2, 8, 16], strides = [1, 1, 1]} : vector<2x8x288xf32> to vector<2x8x16xf32>
    "tpu.trace_start"() <{level = 10 : i32, message = "bqd,bkd->bqk"}> : () -> ()
    %cst_22 = arith.constant dense<0.000000e+00> : vector<2x8x8xf32>
    %59 = tpu.matmul %56, %57, %cst_22 {dimension_numbers = #tpu.dot_dimension_numbers<[2], [2], [1], [1], [0, 0, 0, 1, 1, 1], [0], [0]>} : vector<2x8x16xf32>, vector<2x8x16xf32>, vector<2x8x8xf32> -> vector<2x8x8xf32>
    "tpu.trace_stop"() : () -> ()
    %cst_23 = arith.constant dense<0xFF800000> : vector<2x8xf32>
    %60 = vector.multi_reduction <maximumf>, %59, %cst_23 [2] : vector<2x8x8xf32> to vector<2x8xf32>
    %61 = vector.shape_cast %60 : vector<2x8xf32> to vector<2x8x1xf32>
    %62 = vector.broadcast %61 : vector<2x8x1xf32> to vector<2x8x8xf32>
    %63 = arith.subf %59, %62 : vector<2x8x8xf32>
    %64 = math.exp %63 : vector<2x8x8xf32>
    %cst_24 = arith.constant dense<0.000000e+00> : vector<2x8xf32>
    %65 = vector.multi_reduction <add>, %64, %cst_24 [2] : vector<2x8x8xf32> to vector<2x8xf32>
    %66 = vector.shape_cast %65 : vector<2x8xf32> to vector<2x8x1xf32>
    %67 = vector.broadcast %66 : vector<2x8x1xf32> to vector<2x8x8xf32>
    %68 = arith.divf %64, %67 : vector<2x8x8xf32>
    "tpu.trace_start"() <{level = 10 : i32, message = "bqk,bkd->bqd"}> : () -> ()
    %cst_25 = arith.constant dense<0.000000e+00> : vector<2x8x16xf32>
    %69 = tpu.matmul %68, %58, %cst_25 {dimension_numbers = #tpu.dot_dimension_numbers<[2], [1], [1], [2], [0, 0, 0, 1, 1, 2], [0], [0]>} : vector<2x8x8xf32>, vector<2x8x16xf32>, vector<2x8x16xf32> -> vector<2x8x16xf32>
    "tpu.trace_stop"() : () -> ()
    %70 = vector.shape_cast %69 : vector<2x8x16xf32> to vector<16x16xf32>
    %c0_26 = arith.constant 0 : index
    %c48 = arith.constant 48 : index
    %71 = vector.load %arg7[%c0_26, %c48] : memref<16x96xf32, #tpu.memory_space<vmem>>, vector<16x16xf32>
    tpu.vector_store %arg7[%c0_26, %c48], %70 {strides = array<i32>} : memref<16x96xf32, #tpu.memory_space<vmem>>, vector<16x16xf32>,
    %72 = vector.extract_strided_slice %7 {offsets = [0, 0, 64], sizes = [2, 8, 16], strides = [1, 1, 1]} : vector<2x8x288xf32> to vector<2x8x16xf32>
    %73 = vector.extract_strided_slice %7 {offsets = [0, 0, 160], sizes = [2, 8, 16], strides = [1, 1, 1]} : vector<2x8x288xf32> to vector<2x8x16xf32>
    %74 = vector.extract_strided_slice %7 {offsets = [0, 0, 256], sizes = [2, 8, 16], strides = [1, 1, 1]} : vector<2x8x288xf32> to vector<2x8x16xf32>
    "tpu.trace_start"() <{level = 10 : i32, message = "bqd,bkd->bqk"}> : () -> ()
    %cst_27 = arith.constant dense<0.000000e+00> : vector<2x8x8xf32>
    %75 = tpu.matmul %72, %73, %cst_27 {dimension_numbers = #tpu.dot_dimension_numbers<[2], [2], [1], [1], [0, 0, 0, 1, 1, 1], [0], [0]>} : vector<2x8x16xf32>, vector<2x8x16xf32>, vector<2x8x8xf32> -> vector<2x8x8xf32>
    "tpu.trace_stop"() : () -> ()
    %cst_28 = arith.constant dense<0xFF800000> : vector<2x8xf32>
    %76 = vector.multi_reduction <maximumf>, %75, %cst_28 [2] : vector<2x8x8xf32> to vector<2x8xf32>
    %77 = vector.shape_cast %76 : vector<2x8xf32> to vector<2x8x1xf32>
    %78 = vector.broadcast %77 : vector<2x8x1xf32> to vector<2x8x8xf32>
    %79 = arith.subf %75, %78 : vector<2x8x8xf32>
    %80 = math.exp %79 : vector<2x8x8xf32>
    %cst_29 = arith.constant dense<0.000000e+00> : vector<2x8xf32>
    %81 = vector.multi_reduction <add>, %80, %cst_29 [2] : vector<2x8x8xf32> to vector<2x8xf32>
    %82 = vector.shape_cast %81 : vector<2x8xf32> to vector<2x8x1xf32>
    %83 = vector.broadcast %82 : vector<2x8x1xf32> to vector<2x8x8xf32>
    %84 = arith.divf %80, %83 : vector<2x8x8xf32>
    "tpu.trace_start"() <{level = 10 : i32, message = "bqk,bkd->bqd"}> : () -> ()
    %cst_30 = arith.constant dense<0.000000e+00> : vector<2x8x16xf32>
    %85 = tpu.matmul %84, %74, %cst_30 {dimension_numbers = #tpu.dot_dimension_numbers<[2], [1], [1], [2], [0, 0, 0, 1, 1, 2], [0], [0]>} : vector<2x8x8xf32>, vector<2x8x16xf32>, vector<2x8x16xf32> -> vector<2x8x16xf32>
    "tpu.trace_stop"() : () -> ()
    %86 = vector.shape_cast %85 : vector<2x8x16xf32> to vector<16x16xf32>
    %c0_31 = arith.constant 0 : index
    %c64 = arith.constant 64 : index
    %87 = vector.load %arg7[%c0_31, %c64] : memref<16x96xf32, #tpu.memory_space<vmem>>, vector<16x16xf32>
    tpu.vector_store %arg7[%c0_31, %c64], %86 {strides = array<i32>} : memref<16x96xf32, #tpu.memory_space<vmem>>, vector<16x16xf32>,
    %88 = vector.extract_strided_slice %7 {offsets = [0, 0, 80], sizes = [2, 8, 16], strides = [1, 1, 1]} : vector<2x8x288xf32> to vector<2x8x16xf32>
    %89 = vector.extract_strided_slice %7 {offsets = [0, 0, 176], sizes = [2, 8, 16], strides = [1, 1, 1]} : vector<2x8x288xf32> to vector<2x8x16xf32>
    %90 = vector.extract_strided_slice %7 {offsets = [0, 0, 272], sizes = [2, 8, 16], strides = [1, 1, 1]} : vector<2x8x288xf32> to vector<2x8x16xf32>
    "tpu.trace_start"() <{level = 10 : i32, message = "bqd,bkd->bqk"}> : () -> ()
    %cst_32 = arith.constant dense<0.000000e+00> : vector<2x8x8xf32>
    %91 = tpu.matmul %88, %89, %cst_32 {dimension_numbers = #tpu.dot_dimension_numbers<[2], [2], [1], [1], [0, 0, 0, 1, 1, 1], [0], [0]>} : vector<2x8x16xf32>, vector<2x8x16xf32>, vector<2x8x8xf32> -> vector<2x8x8xf32>
    "tpu.trace_stop"() : () -> ()
    %cst_33 = arith.constant dense<0xFF800000> : vector<2x8xf32>
    %92 = vector.multi_reduction <maximumf>, %91, %cst_33 [2] : vector<2x8x8xf32> to vector<2x8xf32>
    %93 = vector.shape_cast %92 : vector<2x8xf32> to vector<2x8x1xf32>
    %94 = vector.broadcast %93 : vector<2x8x1xf32> to vector<2x8x8xf32>
    %95 = arith.subf %91, %94 : vector<2x8x8xf32>
    %96 = math.exp %95 : vector<2x8x8xf32>
    %cst_34 = arith.constant dense<0.000000e+00> : vector<2x8xf32>
    %97 = vector.multi_reduction <add>, %96, %cst_34 [2] : vector<2x8x8xf32> to vector<2x8xf32>
    %98 = vector.shape_cast %97 : vector<2x8xf32> to vector<2x8x1xf32>
    %99 = vector.broadcast %98 : vector<2x8x1xf32> to vector<2x8x8xf32>
    %100 = arith.divf %96, %99 : vector<2x8x8xf32>
    "tpu.trace_start"() <{level = 10 : i32, message = "bqk,bkd->bqd"}> : () -> ()
    %cst_35 = arith.constant dense<0.000000e+00> : vector<2x8x16xf32>
    %101 = tpu.matmul %100, %90, %cst_35 {dimension_numbers = #tpu.dot_dimension_numbers<[2], [1], [1], [2], [0, 0, 0, 1, 1, 2], [0], [0]>} : vector<2x8x8xf32>, vector<2x8x16xf32>, vector<2x8x16xf32> -> vector<2x8x16xf32>
    "tpu.trace_stop"() : () -> ()
    %102 = vector.shape_cast %101 : vector<2x8x16xf32> to vector<16x16xf32>
    %c0_36 = arith.constant 0 : index
    %c80 = arith.constant 80 : index
    %103 = vector.load %arg7[%c0_36, %c80] : memref<16x96xf32, #tpu.memory_space<vmem>>, vector<16x16xf32>
    tpu.vector_store %arg7[%c0_36, %c80], %102 {strides = array<i32>} : memref<16x96xf32, #tpu.memory_space<vmem>>, vector<16x16xf32>,
    %c0_37 = arith.constant 0 : index
    %c0_38 = arith.constant 0 : index
    %104 = vector.load %arg7[%c0_37, %c0_38] : memref<16x96xf32, #tpu.memory_space<vmem>>, vector<16x96xf32>
    %c0_39 = arith.constant 0 : index
    %c0_40 = arith.constant 0 : index
    %105 = vector.load %arg4[%c0_39, %c0_40] : memref<96x128xf32, #tpu.memory_space<vmem>>, vector<96x128xf32>
    %cst_41 = arith.constant dense<0.000000e+00> : vector<16x128xf32>
    %106 = tpu.matmul %104, %105, %cst_41 {dimension_numbers = #tpu.dot_dimension_numbers<[1], [0], [0], [1], [0, 0, 1, 1], [], []>} : vector<16x96xf32>, vector<96x128xf32>, vector<16x128xf32> -> vector<16x128xf32>
    %c0_42 = arith.constant 0 : index
    %c0_43 = arith.constant 0 : index
    %107 = vector.load %arg5[%c0_42, %c0_43] : memref<1x128xf32, #tpu.memory_space<vmem>>, vector<1x128xf32>
    %108 = vector.broadcast %107 : vector<1x128xf32> to vector<16x128xf32>
    %109 = arith.addf %106, %108 : vector<16x128xf32>
    %110 = vector.shape_cast %109 : vector<16x128xf32> to vector<2x8x128xf32>
    %c0_44 = arith.constant 0 : index
    %c0_45 = arith.constant 0 : index
    %c0_46 = arith.constant 0 : index
    %111 = vector.load %arg6[%c0_44, %c0_45, %c0_46] : memref<2x8x128xf32, #tpu.memory_space<vmem>>, vector<2x8x128xf32>
    tpu.vector_store %arg6[%c0_44, %c0_45, %c0_46], %110 {strides = array<i32>} : memref<2x8x128xf32, #tpu.memory_space<vmem>>, vector<2x8x128xf32>,
    return
  }
  func.func @transform_0(%arg0: i32) -> (i32, i32, i32) {
    %c0_i32 = arith.constant 0 : i32
    %c0_i32_0 = arith.constant 0 : i32
    %c0_i32_1 = arith.constant 0 : i32
    return %arg0, %c0_i32, %c0_i32_0 : i32, i32, i32
  }
  func.func @transform_1(%arg0: i32) -> (i32, i32) {
    %c0_i32 = arith.constant 0 : i32
    %c0_i32_0 = arith.constant 0 : i32
    %c0_i32_1 = arith.constant 0 : i32
    return %c0_i32, %c0_i32_0 : i32, i32
  }
  func.func @transform_2(%arg0: i32) -> (i32, i32) {
    %c0_i32 = arith.constant 0 : i32
    %c0_i32_0 = arith.constant 0 : i32
    %c0_i32_1 = arith.constant 0 : i32
    return %c0_i32, %c0_i32_0 : i32, i32
  }
  func.func @transform_3(%arg0: i32) -> (i32, i32) {
    %c0_i32 = arith.constant 0 : i32
    %c0_i32_0 = arith.constant 0 : i32
    %c0_i32_1 = arith.constant 0 : i32
    return %c0_i32, %c0_i32_0 : i32, i32
  }
  func.func @transform_4(%arg0: i32) -> (i32, i32) {
    %c0_i32 = arith.constant 0 : i32
    %c0_i32_0 = arith.constant 0 : i32
    %c0_i32_1 = arith.constant 0 : i32
    return %c0_i32, %c0_i32_0 : i32, i32
  }
  func.func @transform_5(%arg0: i32) -> (i32, i32, i32) {
    %c0_i32 = arith.constant 0 : i32
    %c0_i32_0 = arith.constant 0 : i32
    %c0_i32_1 = arith.constant 0 : i32
    return %arg0, %c0_i32, %c0_i32_0 : i32, i32, i32
  }
}

</mosaic_0001>

<bundles_post_ra>
// kernel: tpu_custom_call.1
= control target key start
LH: loop header
LB: loop body
LE: loop exit
PB: predicated region body
PF: predicated region fallthrough
CT: control target
= control target key end

     0   :  { %10 = vsyncpa [#allocation4], 0  ;;  %s3252_s0 = inlined_call_operand.hbm [shape: f32[2,8,32], index: 0, kind: input, shape index: {}]   ;;  %s3253_s1 = inlined_call_operand.hbm [shape: f32[32,288], index: 1, kind: input, shape index: {}]   ;;  %s3254_s2 = inlined_call_operand.vmem [shape: f32[1,288], index: 2, kind: input, shape index: {}]   ;;  %s3255_s3 = inlined_call_operand.hbm [shape: f32[96,128], index: 3, kind: input, shape index: {}]   ;;  %s3256_s4 = inlined_call_operand.vmem [shape: f32[1,128], index: 4, kind: input, shape index: {}]   ;;  %s3257_s5 = inlined_call_operand.hbm [shape: f32[2,8,128], index: 5, kind: output, shape index: {}]  }
   0x1   :  { %11 = vsyncpa [#allocation7], 0 }
   0x2   :  { %12 = vsyncpa [#allocation5], 0  ;;  %s2874_s18 = smov [#allocation6]   ;;  %s2780_s22 = scalar_lea.hbm %s3253_s1, 1536 }
   0x3   :  { %s30_s19 = sshll.u32 %s2874_s18, 4  ;;  %p2781_p0 = scmp.ne.s32.totalorder %s3253_s1, %s2780_s22  ;;  %s31_s19 = int_to_ptr.vmem [resolvable:$true] %s30_s19 }
   0x4   :  { %p2784_p1 = scmp.lt.u32.totalorder %s2780_s22, %s3253_s1 }
   0x6   :  { %p2786_p2 = pnand %p2784_p1, %p2781_p0 }
   0x8   :  { %2789 = shalt.err (!%p2786_p2)
}
   0x9   :  { %s2790_s27 = scalar_lea.vmem %s31_s19, 1536  ;;  %p2795_p4 = scmp.lt.s32.totalorder %s31_s19, %s31_s19 }
   0xa   :  { %p2791_p3 = scmp.ne.s32.totalorder %s31_s19, %s2790_s27  ;;  %p2796_p5 = scmp.lt.s32.totalorder %s2790_s27, %s2790_s27 }
   0xc   :  { %p2797_p6 = por %p2796_p5, %p2795_p4 }
   0xe   :  { %p2798_p7 = pnand %p2797_p6, %p2791_p3 }
  0x10   :  { %2801 = shalt.err (!%p2798_p7)
}
  0x11   :  { %s2875_s28 = smov 384   ;;  %s2876_s29 = smov 24  }
  0x12   :  { %36 = dma.hbm_to_vmem [thread:$0]  %s3253_s1, 1536, %s31_s19, [#allocation7], %s2875_s28, %s2875_s28, %s2876_s29  }
  0x13   :  { %s2877_s7 = smov [#allocation3]   ;;  %s2802_s11 = scalar_lea.hbm %s3252_s0, 256 }
  0x14   :  { %s18_s8 = sshll.u32 %s2877_s7, 4  ;;  %p2803_p8 = scmp.ne.s32.totalorder %s3252_s0, %s2802_s11  ;;  %s19_s8 = int_to_ptr.vmem [resolvable:$true] %s18_s8 }
  0x15   :  { %p2806_p9 = scmp.lt.u32.totalorder %s2802_s11, %s3252_s0 }
  0x17   :  { %p2808_p10 = pnand %p2806_p9, %p2803_p8 }
  0x19   :  { %2811 = shalt.err (!%p2808_p10)
}
  0x1a   :  { %s2812_s16 = scalar_lea.vmem %s19_s8, 256  ;;  %p2817_p12 = scmp.lt.s32.totalorder %s19_s8, %s19_s8 }
  0x1b   :  { %p2813_p11 = scmp.ne.s32.totalorder %s19_s8, %s2812_s16  ;;  %p2818_p13 = scmp.lt.s32.totalorder %s2812_s16, %s2812_s16 }
  0x1d   :  { %p2819_p0 = por %p2818_p13, %p2817_p12 }
  0x1f   :  { %p2820_p1 = pnand %p2819_p0, %p2813_p11 }
  0x21   :  { %2823 = shalt.err (!%p2820_p1)
}
  0x22   :  { %s2878_s1 = smov 128   ;;  %s2879_s17 = smov 8  }
  0x23   :  { %24 = dma.hbm_to_vmem [thread:$0]  %s3252_s0, 256, %s19_s8, [#allocation4], %s2878_s1, %s2878_s1, %s2879_s17  }
  0x24   :  { %s2880_s20 = smov [#allocation8]   ;;  %s2824_s24 = scalar_lea.hbm %s3255_s3, 1536 }
  0x25   :  { %s44_s21 = sshll.u32 %s2880_s20, 4  ;;  %p2825_p2 = scmp.ne.s32.totalorder %s3255_s3, %s2824_s24  ;;  %s45_s21 = int_to_ptr.vmem [resolvable:$true] %s44_s21 }
  0x26   :  { %p2828_p3 = scmp.lt.u32.totalorder %s2824_s24, %s3255_s3 }
  0x28   :  { %p2830_p4 = pnand %p2828_p3, %p2825_p2 }
  0x2a   :  { %2833 = shalt.err (!%p2830_p4)
}
  0x2b   :  { %s2834_s29 = scalar_lea.vmem %s45_s21, 1536  ;;  %p2839_p6 = scmp.lt.s32.totalorder %s45_s21, %s45_s21 }
  0x2c   :  { %p2835_p5 = scmp.ne.s32.totalorder %s45_s21, %s2834_s29  ;;  %p2840_p7 = scmp.lt.s32.totalorder %s2834_s29, %s2834_s29 }
  0x2e   :  { %p2841_p8 = por %p2840_p7, %p2839_p6 }
  0x30   :  { %p2842_p9 = pnand %p2841_p8, %p2835_p5 }
  0x32   :  { %2845 = shalt.err (!%p2842_p9)
}
  0x33   :  { %50 = dma.hbm_to_vmem [thread:$0]  %s3255_s3, 1536, %s45_s21, [#allocation7], %s2878_s1, %s2878_s1, %s2879_s17  }
  0x34   :  { %2868 = dma.done.wait [#allocation4], 256  }
  0x35   :  { %2869 = vsyncadd [#allocation4], 4294967040 }
  0x36   :  { %2870 = dma.done.wait [#allocation7], 3072  }
  0x37   :  { %2871 = vsyncadd [#allocation7], 4294964224  ;;  %v2881_v0 = vmov 0.0   ;;  %v65_v1 = vld [vmem:[#allocation6 + $0x8] sm:$0xff]  ;;  %v68_v2 = vld [vmem:[#allocation6 + $0x20] sm:$0xff]  ;;  %vm93_vm0 = vcmask 261120   ;;  %v78_v21 = vlaneseq }
  0x38   :  { %164 = vmatprep.mubr.f32.mxu0 %v2881_v0  ;;  %2538 = vmatprep.subr.mxu1 %v2881_v0  ;;  %v64_v3 = vld [vmem:[#allocation6] sm:$0xff]  ;;  %v2675_v4 = vpack.c.bf16 %v68_v2, %v65_v1  ;;  %v67_v5 = vld [vmem:[#allocation6 + $0x18] sm:$0xff]  ;;  %v74_v7 = vld [vmem:[#allocation6 + $0x50] sm:$0xff]  ;;  %vm2882_vm1 = vmmov 0   ;;  %s2883_s7 = smov 32   ;;  %vm255_vm2 = vcmask 130048  }
  0x39   :  { %v71_v6 = vld [vmem:[#allocation6 + $0x38] sm:$0xff]  ;;  %v2677_v8 = vpack.c.bf16 %v67_v5, %v64_v3  ;;  %v70_v10 = vld [vmem:[#allocation6 + $0x30] sm:$0xff]  ;;  %v73_v11 = vld [vmem:[#allocation6 + $0x48] sm:$0xff]  ;;  %v2971_v22 = vshrl.u32 %v78_v21, 7  ;;  %2540 = vmatprep.mubr.msk.f32.mxu1 %vm2882_vm1, %v2881_v0  ;;  %vm407_vm3 = vcmask 64512   ;;  %s2885_s8 = smov 16  }
  0x3a   :  { %v2679_v9 = vpack.c.bf16 %v74_v7, %v71_v6  ;;  %2676 = vmatprep.subr.bf16.mxu0 %v2675_v4  ;;  %v2681_v12 = vpack.c.bf16 %v73_v11, %v70_v10  ;;  %v62_v13 = vld [vmem:[#allocation3] sm:$0xff]  ;;  %v63_v14 = vld [vmem:[#allocation3 + $0x8] sm:$0xff]  ;;  %v69_v16 = vld [vmem:[#allocation6 + $0x28] sm:$0xff]  ;;  %s2886_s9 = smov 112   ;;  %s2887_s10 = smov 48   ;;  %vm924_vm4 = vcmask 261248  }
  0x3b   :  { %2678 = vmatpush1.bf16.msra.mxu0 %v2677_v8  ;;  %v66_v15 = vld [vmem:[#allocation6 + $0x10] sm:$0xff]  ;;  %v72_v17 = vld [vmem:[#allocation6 + $0x40] sm:$0xff]  ;;  %v75_v19 = vld [vmem:[#allocation6 + $0x58] sm:$0xff]  ;;  %v80_v23 = vsub.s32 0, %v2971_v22  ;;  %v84_v42 = vsub.s32 1, %v2971_v22  ;;  %s2888_s11 = smov 96  }
  0x3c   :  { %2680 = vmatprep.subr.bf16.mxu0 %v2679_v9  ;;  %v2683_v18 = vpack.c.bf16 %v69_v16, %v66_v15  ;;  %v2687_v20 = vpack.c.bf16 %v75_v19, %v72_v17  ;;  %v2981_v24 = vld [vmem:[%s3254_s2] sm:$0x7]  ;;  %s2884_s2 = smov 64   ;;  %s2889_s12 = smov 80   ;;  %vm1261_vm5 = vcmask 392448   ;;  %vm1602_vm6 = vcmask 523648  }
  0x3d   :  { %v81_v25 = vrot.slane %v2981_v24, %v80_v23  ;;  %v85_v43 = vrot.slane %v2981_v24, %v84_v42  ;;  %vm1937_vm7 = vcmask 654848   ;;  %vm2280_vm8 = vcmask 786048   ;;  %s2890_s15 = smov [#allocation9]  }
  0x3e   :  { %vm2304_vm9 = vcmask 785408   ;;  %s2393_s16 = sshll.u32 %s2890_s15, 4  ;;  %s2394_s16 = int_to_ptr.vmem [resolvable:$true] %s2393_s16 }
  0x3f   :  { %2682 = vmatpush1.bf16.msra.mxu0 %v2681_v12  ;;  %s2846_s18 = scalar_lea.vmem %s2394_s16, 256  ;;  %p2851_p11 = scmp.lt.s32.totalorder %s2394_s16, %s2394_s16 }
  0x40   :  { %2684 = vmatprep.subr.bf16.mxu0 %v2683_v18  ;;  %p2847_p10 = scmp.ne.s32.totalorder %s2394_s16, %s2846_s18  ;;  %p2852_p12 = scmp.lt.s32.totalorder %s2846_s18, %s2846_s18 }
  0x42   :  { %2406 = vmatmul.mubr.msk.f32.vlgmr.msra.gmra.mrb[0].mxu0 %vm93_vm0, %v62_v13  ;;  %p2853_p13 = por %p2852_p12, %p2851_p11 }
  0x43   :  { %170 = vmatprep.mubr.f32.mxu0 %v2881_v0  ;;  %2686 = vmatpush3.bf16.msra.mxu0 %v2683_v18 }
  0x44   :  { %2688 = vmatprep.subr.bf16.mxu0 %v2687_v20  ;;  %p2854_p0 = pnand %p2853_p13, %p2847_p10 }
  0x46   :  { %2407 = vmatmul.mubr.msk.f32.gmra.mrb[2].mxu0 %vm93_vm0, %v63_v14 }
  0x47   :  { %2525 = vmatprep.mubr.msk.f32.mxu0 %vm93_vm0, %v62_v13  ;;  %2690 = vmatpush3.bf16.msra.mxu0 %v2687_v20 }
  0x48   :  { %2528 = vmatprep.subr.mxu0 %v2881_v0 }
  0x4a   :  { %2526 = vmatmul.mubr.msk.f32.vlgmr.msra.gmra.mrb[4].mxu0 %vm93_vm0, %v63_v14 }
  0x4b   :  { %2530 = vmatprep.mubr.msk.f32.mxu0 %vm2882_vm1, %v2881_v0 }
 0x115   :  { %v166_v26 = vpop.f32.mrb[0].mxu0 }
 0x116   :  { %v2984_v27 = vadd.f32 %v166_v26, %v81_v25  ;;  %v168_v28 = vpop.f32.mrb[1].mxu0 }
 0x117   :  { %v3012_v44 = vadd.f32 %v168_v28, %v85_v43 }
 0x118   :  { %253 = vrot.lane.b32.xlu0 %v2984_v27, %s2883_s7 }
 0x119   :  { %v172_v29 = vpop.f32.mrb[2].mxu0 }
 0x11a   :  { %v2988_v30 = vadd.f32 %v172_v29, %v81_v25  ;;  %v174_v31 = vpop.f32.mrb[3].mxu0 }
 0x11b   :  { %v3016_v45 = vadd.f32 %v174_v31, %v85_v43 }
 0x11c   :  { %331 = vrot.lane.b32.xlu0 %v2988_v30, %s2883_s7 }
 0x11d   :  { %v2992_v32 = vpop.f32.mrb[4].mxu0 }
 0x11e   :  { %v2994_v33 = vpop.f32.mrb[5].mxu0 }
 0x18a   :  { %v254_v34 = vpop.permute.xlu0 %253 }
 0x18b   :  { %2529 = vmatpush3.xpose.msk.msra.mxu0 %vm255_vm2, %v254_v34 }
 0x18c   :  { %2533 = vmatprep.subr.mxu0 %v2881_v0 }
 0x18e   :  { %2531 = vmatmul.mubr.msk.f32.vlgmr.msra.gmra.mrb[6].mxu0 %vm255_vm2, %v2984_v27  ;;  %v332_v35 = vpop.permute.xlu0 %331 }
 0x18f   :  { %2534 = vmatpush3.xpose.msk.msra.mxu0 %vm255_vm2, %v332_v35  ;;  %2535 = vmatprep.mubr.msk.f32.mxu0 %vm2882_vm1, %v2881_v0 }
 0x190   :  { %2543 = vmatprep.subr.mxu0 %v2881_v0 }
 0x192   :  { %2536 = vmatmul.mubr.msk.f32.vlgmr.msra.gmra.mrb[8].mxu0 %vm255_vm2, %v2988_v30 }
 0x193   :  { %2545 = vmatprep.mubr.msk.f32.mxu0 %vm2882_vm1, %v2881_v0 }
 0x261   :  { %v326_v36 = vpop.f32.mrb[6].mxu0 }
 0x262   :  { %v2532_v37 = vpop.f32.mrb[7].mxu0  ;;  %v408_v38 = vsel %vm407_vm3, %v326_v36, -inf }
 0x263   :  { %409 = vmax.xlane.f32.xlu1 %v408_v38 }
 0x265   :  { %v403_v39 = vpop.f32.mrb[8].mxu0 }
 0x266   :  { %v2537_v40 = vpop.f32.mrb[9].mxu0  ;;  %v411_v41 = vsel %vm407_vm3, %v403_v39, -inf }
 0x267   :  { %412 = vmax.xlane.f32.xlu1 %v411_v41 }
 0x278   :  { %431 = vrot.lane.b32.xlu1 %v3012_v44, %s2884_s2 }
 0x27c   :  { %508 = vrot.lane.b32.xlu1 %v3016_v45, %s2884_s2 }
 0x280   :  { %588 = vrot.lane.b32.xlu1 %v2984_v27, %s2885_s8 }
 0x284   :  { %666 = vrot.lane.b32.xlu1 %v2988_v30, %s2885_s8 }
 0x2f0   :  { %v410_v46 = vpop.xlane.xlu1 %409 }
 0x2f1   :  { %v414_v47 = vsub.f32 %v326_v36, %v410_v46 }
 0x2f3   :  { %v416_v48 = vmul.f32 1.442695, %v414_v47 }
 0x2f4   :  { %v413_v49 = vpop.xlane.xlu1 %412 }
 0x2f5   :  { %2732 = vpow2.f32 %v416_v48  ;;  %v415_v50 = vsub.f32 %v403_v39, %v413_v49 }
 0x2f7   :  { %v418_v51 = vmul.f32 1.442695, %v415_v50 }
 0x2f8   :  { %v432_v52 = vpop.permute.xlu1 %431 }
 0x2f9   :  { %2734 = vpow2.f32 %v418_v51  ;;  %2539 = vmatpush3.msra.mxu1 %v432_v52 }
 0x2fa   :  { %2548 = vmatprep.subr.mxu1 %v2881_v0 }
 0x2fc   :  { %v509_v53 = vpop.permute.xlu1 %508 }
 0x2fd   :  { %2544 = vmatpush3.msra.mxu0 %v509_v53 }
 0x2fe   :  { %2553 = vmatprep.subr.mxu0 %v2881_v0 }
 0x2ff   :  { %v2733_v54 = vpop.eup %2732 }
 0x300   :  { %v420_v55 = vsel %vm407_vm3, %v2733_v54, 0.0  ;;  %v589_v58 = vpop.permute.xlu1 %588 }
 0x301   :  { %421 = vadd.xlane.f32.xlu0 %v420_v55 }
 0x303   :  { %v2735_v56 = vpop.eup %2734 }
 0x304   :  { %v423_v57 = vsel %vm407_vm3, %v2735_v56, 0.0  ;;  %v667_v59 = vpop.permute.xlu1 %666 }
 0x305   :  { %424 = vadd.xlane.f32.xlu1 %v423_v57 }
 0x316   :  { %664 = vrot.lane.b32.xlu1 %v2988_v30, %s2886_s9 }
 0x317   :  { %586 = vrot.lane.b32.xlu0 %v2984_v27, %s2886_s9 }
 0x38e   :  { %v422_v60 = vpop.xlane.xlu0 %421 }
 0x38f   :  { %2736 = vrcp.f32 %v422_v60 }
 0x392   :  { %v425_v61 = vpop.xlane.xlu1 %424  ;;  %v587_v3 = vpop.permute.xlu0 %586 }
 0x393   :  { %2738 = vrcp.f32 %v425_v61 }
 0x396   :  { %v665_v4 = vpop.permute.xlu1 %664 }
 0x399   :  { %v2737_v62 = vpop.eup %2736 }
 0x39a   :  { %v427_v63 = vmul.f32 %v2737_v62, %v2733_v54 }
 0x39c   :  { %2541 = vmatmul.mubr.msk.f32.vlgmr.msra.gmra.mrb[0].mxu1 %vm407_vm3, %v427_v63 }
 0x39d   :  { %v2739_v1 = vpop.eup %2738  ;;  %2549 = vmatpush3.xpose.msk.msra.mxu1 %vm255_vm2, %v589_v58  ;;  %2550 = vmatprep.mubr.msk.f32.mxu1 %vm2882_vm1, %v2881_v0 }
 0x39e   :  { %v429_v2 = vmul.f32 %v2739_v1, %v2735_v56  ;;  %2558 = vmatprep.subr.mxu1 %v2881_v0 }
 0x3a0   :  { %2546 = vmatmul.mubr.msk.f32.vlgmr.msra.gmra.mrb[10].mxu0 %vm407_vm3, %v429_v2  ;;  %2551 = vmatmul.mubr.msk.f32.vlgmr.msra.gmra.mrb[2].mxu1 %vm255_vm2, %v587_v3 }
 0x3a1   :  { %2554 = vmatpush3.xpose.msk.msra.mxu0 %vm255_vm2, %v667_v59  ;;  %2555 = vmatprep.mubr.msk.f32.mxu0 %vm2882_vm1, %v2881_v0 }
 0x3a2   :  { %2563 = vmatprep.subr.mxu0 %v2881_v0  ;;  %2560 = vmatprep.mubr.msk.f32.mxu1 %vm2882_vm1, %v2881_v0 }
 0x3a4   :  { %2556 = vmatmul.mubr.msk.f32.vlgmr.msra.gmra.mrb[12].mxu0 %vm255_vm2, %v665_v4 }
 0x3a5   :  { %2565 = vmatprep.mubr.msk.f32.mxu0 %vm2882_vm1, %v2881_v0 }
 0x46f   :  { %v503_v5 = vpop.f32.mrb[0].mxu1 }
 0x470   :  { %584 = vst.msk [vmem:[#allocation2] sm:$0xff] %vm255_vm2, %v503_v5  ;;  %v2542_v6 = vpop.f32.mrb[1].mxu1 }
 0x473   :  { %v580_v7 = vpop.f32.mrb[10].mxu0  ;;  %v660_v8 = vpop.f32.mrb[2].mxu1 }
 0x474   :  { %585 = vst.msk [vmem:[#allocation2 + $0x8] sm:$0xff] %vm255_vm2, %v580_v7  ;;  %v2547_v9 = vpop.f32.mrb[11].mxu0  ;;  %v2552_v10 = vpop.f32.mrb[3].mxu1  ;;  %v742_v11 = vsel %vm407_vm3, %v660_v8, -inf }
 0x475   :  { %743 = vmax.xlane.f32.xlu1 %v742_v11 }
 0x477   :  { %v738_v12 = vpop.f32.mrb[12].mxu0 }
 0x478   :  { %v2557_v13 = vpop.f32.mrb[13].mxu0  ;;  %v745_v14 = vsel %vm407_vm3, %v738_v12, -inf }
 0x479   :  { %746 = vmax.xlane.f32.xlu0 %v745_v14 }
 0x486   :  { %764 = vrot.lane.b32.xlu1 %v3012_v44, %s2887_s10 }
 0x48a   :  { %927 = vrot.lane.b32.xlu1 %v2984_v27, %s2888_s11 }
 0x48f   :  { %840 = vrot.lane.b32.xlu0 %v3016_v45, %s2887_s10 }
 0x502   :  { %v744_v15 = vpop.xlane.xlu1 %743 }
 0x503   :  { %v748_v16 = vsub.f32 %v660_v8, %v744_v15 }
 0x505   :  { %v750_v17 = vmul.f32 1.442695, %v748_v16 }
 0x506   :  { %v765_v18 = vpop.permute.xlu1 %764  ;;  %v747_v19 = vpop.xlane.xlu0 %746 }
 0x507   :  { %2740 = vpow2.f32 %v750_v17  ;;  %v749_v20 = vsub.f32 %v738_v12, %v747_v19  ;;  %2559 = vmatpush3.msra.mxu1 %v765_v18 }
 0x508   :  { %2568 = vmatprep.subr.mxu1 %v2881_v0 }
 0x509   :  { %v752_v21 = vmul.f32 1.442695, %v749_v20 }
 0x50a   :  { %v841_v23 = vpop.permute.xlu0 %840  ;;  %v928_v31 = vpop.permute.xlu1 %927 }
 0x50b   :  { %2742 = vpow2.f32 %v752_v21  ;;  %2564 = vmatpush3.msra.mxu0 %v841_v23 }
 0x50c   :  { %2573 = vmatprep.subr.mxu0 %v2881_v0 }
 0x511   :  { %v2741_v25 = vpop.eup %2740 }
 0x512   :  { %v754_v26 = vsel %vm407_vm3, %v2741_v25, 0.0 }
 0x513   :  { %755 = vadd.xlane.f32.xlu1 %v754_v26 }
 0x515   :  { %v2743_v28 = vpop.eup %2742 }
 0x516   :  { %v757_v29 = vsel %vm407_vm3, %v2743_v28, 0.0 }
 0x517   :  { %758 = vadd.xlane.f32.xlu1 %v757_v29 }
 0x528   :  { %1003 = vrot.lane.b32.xlu1 %v2988_v30, %s2888_s11 }
 0x5a0   :  { %v756_v34 = vpop.xlane.xlu1 %755 }
 0x5a1   :  { %2744 = vrcp.f32 %v756_v34 }
 0x5a4   :  { %v759_v35 = vpop.xlane.xlu1 %758 }
 0x5a5   :  { %2746 = vrcp.f32 %v759_v35 }
 0x5a8   :  { %v1004_v40 = vpop.permute.xlu1 %1003 }
 0x5ab   :  { %v2745_v36 = vpop.eup %2744 }
 0x5ac   :  { %v761_v37 = vmul.f32 %v2745_v36, %v2741_v25 }
 0x5ae   :  { %2561 = vmatmul.mubr.msk.f32.vlgmr.msra.gmra.mrb[4].mxu1 %vm407_vm3, %v761_v37 }
 0x5af   :  { %v2747_v38 = vpop.eup %2746  ;;  %2569 = vmatpush3.xpose.msk.msra.mxu1 %vm255_vm2, %v3012_v44  ;;  %2570 = vmatprep.mubr.msk.f32.mxu1 %vm2882_vm1, %v2881_v0 }
 0x5b0   :  { %v763_v39 = vmul.f32 %v2747_v38, %v2743_v28  ;;  %2578 = vmatprep.subr.mxu1 %v2881_v0 }
 0x5b2   :  { %2566 = vmatmul.mubr.msk.f32.vlgmr.msra.gmra.mrb[14].mxu0 %vm407_vm3, %v763_v39  ;;  %2571 = vmatmul.mubr.msk.f32.vlgmr.msra.gmra.mrb[6].mxu1 %vm255_vm2, %v928_v31 }
 0x5b3   :  { %2574 = vmatpush3.xpose.msk.msra.mxu0 %vm255_vm2, %v3016_v45  ;;  %2575 = vmatprep.mubr.msk.f32.mxu0 %vm2882_vm1, %v2881_v0 }
 0x5b4   :  { %2583 = vmatprep.subr.mxu0 %v2881_v0  ;;  %2580 = vmatprep.mubr.msk.f32.mxu1 %vm2882_vm1, %v2881_v0 }
 0x5b6   :  { %2576 = vmatmul.mubr.msk.f32.vlgmr.msra.gmra.mrb[16].mxu0 %vm255_vm2, %v1004_v40 }
 0x5b7   :  { %2585 = vmatprep.mubr.msk.f32.mxu0 %vm2882_vm1, %v2881_v0 }
 0x681   :  { %v3082_v41 = vpop.f32.mrb[4].mxu1 }
 0x682   :  { %v2562_v42 = vpop.f32.mrb[5].mxu1 }
 0x685   :  { %v3084_v43 = vpop.f32.mrb[14].mxu0  ;;  %v999_v46 = vpop.f32.mrb[6].mxu1 }
 0x686   :  { %v2567_v47 = vpop.f32.mrb[15].mxu0  ;;  %v2572_v48 = vpop.f32.mrb[7].mxu1  ;;  %v1079_v49 = vsel %vm407_vm3, %v999_v46, -inf }
 0x687   :  { %1080 = vmax.xlane.f32.xlu0 %v1079_v49 }
 0x689   :  { %v1075_v50 = vpop.f32.mrb[16].mxu0 }
 0x68a   :  { %v2577_v51 = vpop.f32.mrb[17].mxu0  ;;  %v1082_v52 = vsel %vm407_vm3, %v1075_v50, -inf }
 0x68b   :  { %1083 = vmax.xlane.f32.xlu1 %v1082_v52 }
 0x69c   :  { %1101 = vrot.lane.b32.xlu1 %v3012_v44, %s2883_s7 }
 0x69d   :  { %1177 = vrot.lane.b32.xlu0 %v3016_v45, %s2883_s7 }
 0x6a0   :  { %1266 = vrot.lane.b32.xlu1 %v3012_v44, %s2886_s9 }
 0x6a4   :  { %1344 = vrot.lane.b32.xlu1 %v3016_v45, %s2886_s9 }
 0x6a8   :  { %1342 = vrot.lane.b32.xlu1 %v2988_v30, %s2889_s12 }
 0x714   :  { %v1081_v53 = vpop.xlane.xlu0 %1080 }
 0x715   :  { %v1085_v54 = vsub.f32 %v999_v46, %v1081_v53  ;;  %v88_v46 = vsub.s32 2, %v2971_v22 }
 0x717   :  { %v1087_v55 = vmul.f32 1.442695, %v1085_v54 }
 0x718   :  { %v1084_v56 = vpop.xlane.xlu1 %1083  ;;  %v1178_v57 = vpop.permute.xlu0 %1177 }
 0x719   :  { %2748 = vpow2.f32 %v1087_v55  ;;  %v1086_v58 = vsub.f32 %v1075_v50, %v1084_v56  ;;  %2584 = vmatpush3.msra.mxu0 %v1178_v57  ;;  %v89_v50 = vrot.slane %v2981_v24, %v88_v46 }
 0x71a   :  { %2593 = vmatprep.subr.mxu0 %v2881_v0 }
 0x71b   :  { %v1089_v59 = vmul.f32 1.442695, %v1086_v58  ;;  %v3150_v54 = vadd.f32 %v2994_v33, %v89_v50  ;;  %v3160_v24 = vadd.f32 %v2992_v32, %v89_v50 }
 0x71c   :  { %v1102_v60 = vpop.permute.xlu1 %1101 }
 0x71d   :  { %2750 = vpow2.f32 %v1089_v59  ;;  %2579 = vmatpush3.msra.mxu1 %v1102_v60 }
 0x71e   :  { %2588 = vmatprep.subr.mxu1 %v2881_v0 }
 0x720   :  { %v1267_v4 = vpop.permute.xlu1 %1266 }
 0x723   :  { %v2749_v61 = vpop.eup %2748 }
 0x724   :  { %v1091_v62 = vsel %vm407_vm3, %v2749_v61, 0.0  ;;  %v1345_v8 = vpop.permute.xlu1 %1344 }
 0x725   :  { %1092 = vadd.xlane.f32.xlu0 %v1091_v62 }
 0x727   :  { %v2751_v63 = vpop.eup %2750 }
 0x728   :  { %v1094_v1 = vsel %vm407_vm3, %v2751_v63, 0.0  ;;  %v1343_v11 = vpop.permute.xlu1 %1342 }
 0x729   :  { %1095 = vadd.xlane.f32.xlu0 %v1094_v1 }
 0x73f   :  { %1264 = vrot.lane.b32.xlu0 %v2984_v27, %s2889_s12 }
 0x7b2   :  { %v1093_v2 = vpop.xlane.xlu0 %1092 }
 0x7b3   :  { %2752 = vrcp.f32 %v1093_v2 }
 0x7b6   :  { %v1096_v3 = vpop.xlane.xlu0 %1095 }
 0x7b7   :  { %2754 = vrcp.f32 %v1096_v3 }
 0x7ba   :  { %v1265_v10 = vpop.permute.xlu0 %1264 }
 0x7bd   :  { %v2753_v5 = vpop.eup %2752 }
 0x7be   :  { %v1098_v6 = vmul.f32 %v2753_v5, %v2749_v61 }
 0x7c0   :  { %2581 = vmatmul.mubr.msk.f32.vlgmr.msra.gmra.mrb[8].mxu1 %vm407_vm3, %v1098_v6 }
 0x7c1   :  { %v2755_v7 = vpop.eup %2754  ;;  %2589 = vmatpush3.xpose.msk.msra.mxu1 %vm255_vm2, %v1267_v4  ;;  %2590 = vmatprep.mubr.msk.f32.mxu1 %vm2882_vm1, %v2881_v0 }
 0x7c2   :  { %v1100_v9 = vmul.f32 %v2755_v7, %v2751_v63  ;;  %2598 = vmatprep.subr.mxu1 %v2881_v0 }
 0x7c4   :  { %2586 = vmatmul.mubr.msk.f32.vlgmr.msra.gmra.mrb[18].mxu0 %vm407_vm3, %v1100_v9  ;;  %2591 = vmatmul.mubr.msk.f32.vlgmr.msra.gmra.mrb[10].mxu1 %vm255_vm2, %v1265_v10 }
 0x7c5   :  { %2594 = vmatpush3.xpose.msk.msra.mxu0 %vm255_vm2, %v1345_v8  ;;  %2595 = vmatprep.mubr.msk.f32.mxu0 %vm2882_vm1, %v2881_v0 }
 0x7c6   :  { %2603 = vmatprep.subr.mxu0 %v2881_v0  ;;  %2600 = vmatprep.mubr.msk.f32.mxu1 %vm2882_vm1, %v2881_v0 }
 0x7c8   :  { %2596 = vmatmul.mubr.msk.f32.vlgmr.msra.gmra.mrb[20].mxu0 %vm255_vm2, %v1343_v11 }
 0x7c9   :  { %2605 = vmatprep.mubr.msk.f32.mxu0 %vm2882_vm1, %v2881_v0 }
 0x893   :  { %v3120_v12 = vpop.f32.mrb[8].mxu1 }
 0x894   :  { %v2582_v13 = vpop.f32.mrb[9].mxu1 }
 0x897   :  { %v3122_v14 = vpop.f32.mrb[18].mxu0  ;;  %v1338_v15 = vpop.f32.mrb[10].mxu1 }
 0x898   :  { %v2587_v16 = vpop.f32.mrb[19].mxu0  ;;  %v2592_v17 = vpop.f32.mrb[11].mxu1  ;;  %v1420_v18 = vsel %vm407_vm3, %v1338_v15, -inf }
 0x899   :  { %1421 = vmax.xlane.f32.xlu0 %v1420_v18 }
 0x89b   :  { %v1416_v19 = vpop.f32.mrb[20].mxu0 }
 0x89c   :  { %v2597_v20 = vpop.f32.mrb[21].mxu0  ;;  %v1423_v21 = vsel %vm407_vm3, %v1416_v19, -inf }
 0x89d   :  { %1424 = vmax.xlane.f32.xlu1 %v1423_v21 }
 0x8ae   :  { %1442 = vrot.lane.b32.xlu1 %v3012_v44, %s2885_s8 }
 0x8af   :  { %1518 = vrot.lane.b32.xlu0 %v3016_v45, %s2885_s8 }
 0x8b2   :  { %1607 = vrot.lane.b32.xlu1 %v3012_v44, %s2888_s11 }
 0x8b6   :  { %1685 = vrot.lane.b32.xlu1 %v3016_v45, %s2888_s11 }
 0x8ba   :  { %1683 = vrot.lane.b32.xlu1 %v2988_v30, %s2884_s2 }
 0x926   :  { %v1422_v23 = vpop.xlane.xlu0 %1421 }
 0x927   :  { %v1426_v25 = vsub.f32 %v1338_v15, %v1422_v23 }
 0x929   :  { %v1428_v26 = vmul.f32 1.442695, %v1426_v25 }
 0x92a   :  { %v1425_v28 = vpop.xlane.xlu1 %1424  ;;  %v1519_v29 = vpop.permute.xlu0 %1518 }
 0x92b   :  { %2756 = vpow2.f32 %v1428_v26  ;;  %v1427_v31 = vsub.f32 %v1416_v19, %v1425_v28  ;;  %2604 = vmatpush3.msra.mxu0 %v1519_v29 }
 0x92c   :  { %2613 = vmatprep.subr.mxu0 %v2881_v0 }
 0x92d   :  { %v1430_v34 = vmul.f32 1.442695, %v1427_v31 }
 0x92e   :  { %v1443_v35 = vpop.permute.xlu1 %1442 }
 0x92f   :  { %2758 = vpow2.f32 %v1430_v34  ;;  %2599 = vmatpush3.msra.mxu1 %v1443_v35 }
 0x930   :  { %2608 = vmatprep.subr.mxu1 %v2881_v0 }
 0x932   :  { %v1608_v47 = vpop.permute.xlu1 %1607 }
 0x935   :  { %v2757_v36 = vpop.eup %2756 }
 0x936   :  { %v1432_v37 = vsel %vm407_vm3, %v2757_v36, 0.0  ;;  %v1686_v52 = vpop.permute.xlu1 %1685 }
 0x937   :  { %1433 = vadd.xlane.f32.xlu0 %v1432_v37 }
 0x939   :  { %v2759_v38 = vpop.eup %2758 }
 0x93a   :  { %v1435_v39 = vsel %vm407_vm3, %v2759_v38, 0.0  ;;  %v1684_v55 = vpop.permute.xlu1 %1683 }
 0x93b   :  { %1436 = vadd.xlane.f32.xlu0 %v1435_v39 }
 0x951   :  { %1605 = vrot.lane.b32.xlu0 %v2984_v27, %s2884_s2 }
 0x9c4   :  { %v1434_v40 = vpop.xlane.xlu0 %1433 }
 0x9c5   :  { %2760 = vrcp.f32 %v1434_v40 }
 0x9c8   :  { %v1437_v42 = vpop.xlane.xlu0 %1436 }
 0x9c9   :  { %2762 = vrcp.f32 %v1437_v42 }
 0x9cc   :  { %v1606_v22 = vpop.permute.xlu0 %1605 }
 0x9cf   :  { %v2761_v48 = vpop.eup %2760 }
 0x9d0   :  { %v1439_v49 = vmul.f32 %v2761_v48, %v2757_v36 }
 0x9d2   :  { %2601 = vmatmul.mubr.msk.f32.vlgmr.msra.gmra.mrb[12].mxu1 %vm407_vm3, %v1439_v49 }
 0x9d3   :  { %v2763_v51 = vpop.eup %2762  ;;  %2609 = vmatpush3.xpose.msk.msra.mxu1 %vm255_vm2, %v1608_v47  ;;  %2610 = vmatprep.mubr.msk.f32.mxu1 %vm2882_vm1, %v2881_v0 }
 0x9d4   :  { %v1441_v53 = vmul.f32 %v2763_v51, %v2759_v38  ;;  %2618 = vmatprep.subr.mxu1 %v2881_v0 }
 0x9d6   :  { %2606 = vmatmul.mubr.msk.f32.vlgmr.msra.gmra.mrb[22].mxu0 %vm407_vm3, %v1441_v53  ;;  %2611 = vmatmul.mubr.msk.f32.vlgmr.msra.gmra.mrb[14].mxu1 %vm255_vm2, %v1606_v22 }
 0x9d7   :  { %2614 = vmatpush3.xpose.msk.msra.mxu0 %vm255_vm2, %v1686_v52  ;;  %2619 = vmatpush3.msra.mxu1 %v3150_v54 }
 0x9d8   :  { %2615 = vmatprep.mubr.msk.f32.mxu0 %vm2882_vm1, %v2881_v0  ;;  %2623 = vmatprep.subr.mxu0 %v2881_v0 }
 0x9d9   :  { %2620 = vmatprep.mubr.msk.f32.mxu1 %vm2882_vm1, %v2881_v0  ;;  %2628 = vmatprep.subr.mxu1 %v2881_v0 }
 0x9da   :  { %2616 = vmatmul.mubr.msk.f32.vlgmr.msra.gmra.mrb[24].mxu0 %vm255_vm2, %v1684_v55 }
 0x9db   :  { %2624 = vmatpush3.msra.mxu0 %v3160_v24  ;;  %2625 = vmatprep.mubr.msk.f32.mxu0 %vm2882_vm1, %v2881_v0 }
 0x9dc   :  { %2633 = vmatprep.subr.mxu0 %v2881_v0 }
 0xaa5   :  { %v3170_v33 = vpop.f32.mrb[12].mxu1 }
 0xaa6   :  { %v2602_v56 = vpop.f32.mrb[13].mxu1 }
 0xaa9   :  { %v3172_v32 = vpop.f32.mrb[22].mxu0  ;;  %v1679_v57 = vpop.f32.mrb[14].mxu1 }
 0xaaa   :  { %v2607_v58 = vpop.f32.mrb[23].mxu0  ;;  %v2612_v59 = vpop.f32.mrb[15].mxu1  ;;  %v1761_v60 = vsel %vm407_vm3, %v1679_v57, -inf }
 0xaab   :  { %1762 = vmax.xlane.f32.xlu0 %v1761_v60  ;;  %v2287_v58 = vld [vmem:[#allocation8 + $0x10] sm:$0xff]  ;;  %v2288_v60 = vld [vmem:[#allocation8 + $0x18] sm:$0xff] }
 0xaad   :  { %v1757_v61 = vpop.f32.mrb[24].mxu0 }
 0xaae   :  { %v2617_v62 = vpop.f32.mrb[25].mxu0  ;;  %v1764_v63 = vsel %vm407_vm3, %v1757_v61, -inf }
 0xaaf   :  { %1765 = vmax.xlane.f32.xlu1 %v1764_v63  ;;  %v2289_v62 = vld [vmem:[#allocation8 + $0x20] sm:$0xff]  ;;  %v2290_v63 = vld [vmem:[#allocation8 + $0x28] sm:$0xff] }
 0xac0   :  { %1942 = vrot.lane.b32.xlu1 %v3012_v44, %s2889_s12 }
 0xac4   :  { %1940 = vrot.lane.b32.xlu1 %v2984_v27, %s2887_s10 }
 0xac8   :  { %2018 = vrot.lane.b32.xlu1 %v2988_v30, %s2887_s10 }
 0xb38   :  { %v1763_v1 = vpop.xlane.xlu0 %1762 }
 0xb39   :  { %v1767_v2 = vsub.f32 %v1679_v57, %v1763_v1  ;;  %v2286_v57 = vld [vmem:[#allocation8 + $0x8] sm:$0xff]  ;;  %v2699_v1 = vpack.c.bf16 %v2290_v63, %v2289_v62 }
 0xb3b   :  { %v1769_v3 = vmul.f32 1.442695, %v1767_v2  ;;  %v2291_v2 = vld [vmem:[#allocation8 + $0x30] sm:$0xff] }
 0xb3c   :  { %v1766_v4 = vpop.xlane.xlu1 %1765 }
 0xb3d   :  { %2764 = vpow2.f32 %v1769_v3  ;;  %v1768_v5 = vsub.f32 %v1757_v61, %v1766_v4  ;;  %v2695_v61 = vpack.c.bf16 %v2288_v60, %v2287_v58  ;;  %v2292_v3 = vld [vmem:[#allocation8 + $0x38] sm:$0xff] }
 0xb3e   :  { %v2703_v4 = vpack.c.bf16 %v2292_v3, %v2291_v2 }
 0xb3f   :  { %v1771_v6 = vmul.f32 1.442695, %v1768_v5  ;;  %v2293_v5 = vld [vmem:[#allocation8 + $0x40] sm:$0xff] }
 0xb40   :  { %v1943_v10 = vpop.permute.xlu1 %1942 }
 0xb41   :  { %2766 = vpow2.f32 %v1771_v6  ;;  %v2294_v6 = vld [vmem:[#allocation8 + $0x48] sm:$0xff] }
 0xb44   :  { %v1941_v16 = vpop.permute.xlu1 %1940 }
 0xb47   :  { %v2765_v7 = vpop.eup %2764 }
 0xb48   :  { %v1773_v8 = vsel %vm407_vm3, %v2765_v7, 0.0  ;;  %v2019_v18 = vpop.permute.xlu1 %2018 }
 0xb49   :  { %1774 = vadd.xlane.f32.xlu0 %v1773_v8  ;;  %v2295_v8 = vld [vmem:[#allocation8 + $0x50] sm:$0xff] }
 0xb4b   :  { %v2767_v9 = vpop.eup %2766 }
 0xb4c   :  { %v1776_v44 = vsel %vm407_vm3, %v2767_v9, 0.0 }
 0xb4d   :  { %1777 = vadd.xlane.f32.xlu0 %v1776_v44 }
 0xb63   :  { %2020 = vrot.lane.b32.xlu0 %v3016_v45, %s2889_s12 }
 0xbd6   :  { %v1775_v27 = vpop.xlane.xlu0 %1774 }
 0xbd7   :  { %2768 = vrcp.f32 %v1775_v27 }
 0xbda   :  { %v1778_v30 = vpop.xlane.xlu0 %1777 }
 0xbdb   :  { %2770 = vrcp.f32 %v1778_v30 }
 0xbde   :  { %v2021_v45 = vpop.permute.xlu0 %2020 }
 0xbe1   :  { %v2769_v11 = vpop.eup %2768 }
 0xbe2   :  { %v1780_v13 = vmul.f32 %v2769_v11, %v2765_v7  ;;  %v2707_v7 = vpack.c.bf16 %v2294_v6, %v2293_v5 }
 0xbe4   :  { %2621 = vmatmul.mubr.msk.f32.vlgmr.msra.gmra.mrb[16].mxu1 %vm407_vm3, %v1780_v13 }
 0xbe5   :  { %v2771_v15 = vpop.eup %2770  ;;  %2629 = vmatpush3.xpose.msk.msra.mxu1 %vm255_vm2, %v1943_v10  ;;  %2630 = vmatprep.mubr.msk.f32.mxu1 %vm2882_vm1, %v2881_v0 }
 0xbe6   :  { %v1782_v17 = vmul.f32 %v2771_v15, %v2767_v9  ;;  %2638 = vmatprep.subr.mxu1 %v2881_v0  ;;  %v2296_v9 = vld [vmem:[#allocation8 + $0x58] sm:$0xff] }
 0xbe7   :  { %v2711_v44 = vpack.c.bf16 %v2296_v9, %v2295_v8 }
 0xbe8   :  { %2626 = vmatmul.mubr.msk.f32.vlgmr.msra.gmra.mrb[26].mxu0 %vm407_vm3, %v1782_v17  ;;  %2631 = vmatmul.mubr.msk.f32.vlgmr.msra.gmra.mrb[18].mxu1 %vm255_vm2, %v1941_v16 }
 0xbe9   :  { %2634 = vmatpush3.xpose.msk.msra.mxu0 %vm255_vm2, %v2021_v45  ;;  %2635 = vmatprep.mubr.msk.f32.mxu0 %vm2882_vm1, %v2881_v0  ;;  %v2446_v45 = vld [vmem:[%s3256_s4] ss:$0 sm:$0xff] }
 0xbea   :  { %2643 = vmatprep.subr.mxu0 %v2881_v0  ;;  %2640 = vmatprep.mubr.msk.f32.mxu1 %vm2882_vm1, %v2881_v0 }
 0xbec   :  { %2636 = vmatmul.mubr.msk.f32.vlgmr.msra.gmra.mrb[28].mxu0 %vm255_vm2, %v2019_v18 }
 0xbed   :  { %2645 = vmatprep.mubr.msk.f32.mxu0 %vm2882_vm1, %v2881_v0 }
 0xcb7   :  { %v1852_v19 = vpop.f32.mrb[16].mxu1 }
 0xcb8   :  { %v2622_v20 = vpop.f32.mrb[17].mxu1 }
 0xcbb   :  { %v1925_v21 = vpop.f32.mrb[26].mxu0  ;;  %v2014_v23 = vpop.f32.mrb[18].mxu1 }
 0xcbc   :  { %v2627_v25 = vpop.f32.mrb[27].mxu0  ;;  %v2632_v26 = vpop.f32.mrb[19].mxu1  ;;  %v2096_v28 = vsel %vm407_vm3, %v2014_v23, -inf }
 0xcbd   :  { %2097 = vmax.xlane.f32.xlu0 %v2096_v28 }
 0xcbf   :  { %v2092_v29 = vpop.f32.mrb[28].mxu0 }
 0xcc0   :  { %v2637_v31 = vpop.f32.mrb[29].mxu0  ;;  %v2099_v34 = vsel %vm407_vm3, %v2092_v29, -inf }
 0xcc1   :  { %2100 = vmax.xlane.f32.xlu1 %v2099_v34 }
 0xcd2   :  { %2119 = vrot.lane.b32.xlu1 %v3150_v54, %s2886_s9 }
 0xcd6   :  { %918 = vrot.lane.b32.xlu1 %v3082_v41, %s2885_s8 }
 0xcda   :  { %920 = vrot.lane.b32.xlu1 %v3084_v43, %s2885_s8 }
 0xcde   :  { %1257 = vrot.lane.b32.xlu1 %v3122_v14, %s2883_s7 }
 0xce2   :  { %1598 = vrot.lane.b32.xlu1 %v3172_v32, %s2887_s10  ;;  %v2285_v32 = vld [vmem:[#allocation8] sm:$0xff] }
 0xce3   :  { %v2691_v59 = vpack.c.bf16 %v2286_v57, %v2285_v32 }
 0xce6   :  { %1933 = vrot.lane.b32.xlu1 %v1925_v21, %s2884_s2 }
 0xd4a   :  { %v2098_v0 = vpop.xlane.xlu0 %2097 }
 0xd4b   :  { %v2102_v35 = vsub.f32 %v2014_v23, %v2098_v0 }
 0xd4d   :  { %v2104_v36 = vmul.f32 1.442695, %v2102_v35 }
 0xd4e   :  { %v2101_v37 = vpop.xlane.xlu1 %2100 }
 0xd4f   :  { %2772 = vpow2.f32 %v2104_v36  ;;  %v2103_v38 = vsub.f32 %v2092_v29, %v2101_v37 }
 0xd51   :  { %v2106_v39 = vmul.f32 1.442695, %v2103_v38 }
 0xd52   :  { %v2120_v40 = vpop.permute.xlu1 %2119 }
 0xd53   :  { %2774 = vpow2.f32 %v2106_v39  ;;  %2639 = vmatpush3.msra.mxu1 %v2120_v40 }
 0xd54   :  { %2692 = vmatprep.subr.bf16.mxu1 %v2691_v59 }
 0xd56   :  { %v919_v41 = vpop.permute.xlu1 %918 }
 0xd57   :  { %925 = vst.msk [vmem:[#allocation2] sm:$0xff] %vm924_vm4, %v919_v41 }
 0xd59   :  { %v2773_v43 = vpop.eup %2772 }
 0xd5a   :  { %v921_v14 = vpop.permute.xlu1 %920  ;;  %v2108_v42 = vsel %vm407_vm3, %v2773_v43, 0.0 }
 0xd5b   :  { %926 = vst.msk [vmem:[#allocation2 + $0x8] sm:$0xff] %vm924_vm4, %v921_v14  ;;  %2109 = vadd.xlane.f32.xlu0 %v2108_v42 }
 0xd5d   :  { %v2775_v46 = vpop.eup %2774 }
 0xd5e   :  { %v1258_v47 = vpop.permute.xlu1 %1257  ;;  %v2111_v48 = vsel %vm407_vm3, %v2775_v46, 0.0 }
 0xd5f   :  { %1263 = vst.msk [vmem:[#allocation2 + $0x8] sm:$0xff] %vm1261_vm5, %v1258_v47  ;;  %2112 = vadd.xlane.f32.xlu0 %v2111_v48 }
 0xd62   :  { %v1599_v49 = vpop.permute.xlu1 %1598 }
 0xd63   :  { %1604 = vst.msk [vmem:[#allocation2 + $0x8] sm:$0xff] %vm1602_vm6, %v1599_v49 }
 0xd66   :  { %v1934_v50 = vpop.permute.xlu1 %1933 }
 0xd67   :  { %1939 = vst.msk [vmem:[#allocation2 + $0x8] sm:$0xff] %vm1937_vm7, %v1934_v50 }
 0xd75   :  { %2196 = vrot.lane.b32.xlu0 %v3160_v24, %s2886_s9 }
 0xd79   :  { %1255 = vrot.lane.b32.xlu0 %v3120_v12, %s2883_s7 }
 0xd7d   :  { %1596 = vrot.lane.b32.xlu0 %v3170_v33, %s2887_s10 }
 0xd81   :  { %1931 = vrot.lane.b32.xlu0 %v1852_v19, %s2884_s2 }
 0xde8   :  { %v2110_v51 = vpop.xlane.xlu0 %2109 }
 0xde9   :  { %2776 = vrcp.f32 %v2110_v51 }
 0xdec   :  { %v2113_v52 = vpop.xlane.xlu0 %2112 }
 0xded   :  { %2778 = vrcp.f32 %v2113_v52 }
 0xdf0   :  { %v2197_v53 = vpop.permute.xlu0 %2196 }
 0xdf1   :  { %2644 = vmatpush3.msra.mxu0 %v2197_v53 }
 0xdf3   :  { %v2777_v54 = vpop.eup %2776 }
 0xdf4   :  { %v2115_v22 = vmul.f32 %v2777_v54, %v2773_v43  ;;  %v1256_v55 = vpop.permute.xlu0 %1255 }
 0xdf5   :  { %1262 = vst.msk [vmem:[#allocation2] sm:$0xff] %vm1261_vm5, %v1256_v55 }
 0xdf6   :  { %2641 = vmatmul.mubr.msk.f32.vlgmr.msra.gmra.mrb[20].mxu1 %vm407_vm3, %v2115_v22 }
 0xdf7   :  { %v2779_v24 = vpop.eup %2778  ;;  %2694 = vmatpush3.bf16.msra.mxu1 %v2691_v59 }
 0xdf8   :  { %v2117_v12 = vmul.f32 %v2779_v24, %v2775_v46  ;;  %v1597_v56 = vpop.permute.xlu0 %1596  ;;  %2696 = vmatprep.subr.bf16.mxu1 %v2695_v61 }
 0xdf9   :  { %1603 = vst.msk [vmem:[#allocation2] sm:$0xff] %vm1602_vm6, %v1597_v56 }
 0xdfa   :  { %2646 = vmatmul.mubr.msk.f32.vlgmr.msra.gmra.mrb[30].mxu0 %vm407_vm3, %v2117_v12 }
 0xdfb   :  { %2698 = vmatpush3.bf16.msra.mxu1 %v2695_v61 }
 0xdfc   :  { %v1932_v33 = vpop.permute.xlu0 %1931  ;;  %2700 = vmatprep.subr.bf16.mxu1 %v2699_v1 }
 0xdfd   :  { %1938 = vst.msk [vmem:[#allocation2] sm:$0xff] %vm1937_vm7, %v1932_v33 }
 0xdff   :  { %2702 = vmatpush3.bf16.msra.mxu1 %v2699_v1 }
 0xe00   :  { %2704 = vmatprep.subr.bf16.mxu1 %v2703_v4 }
 0xe03   :  { %2706 = vmatpush3.bf16.msra.mxu1 %v2703_v4 }
 0xe04   :  { %2708 = vmatprep.subr.bf16.mxu1 %v2707_v7 }
 0xe07   :  { %2710 = vmatpush3.bf16.msra.mxu1 %v2707_v7 }
 0xe08   :  { %2712 = vmatprep.subr.bf16.mxu1 %v2711_v44 }
 0xe0b   :  { %2714 = vmatpush3.bf16.msra.mxu1 %v2711_v44 }
 0xec9   :  { %v2191_v27 = vpop.f32.mrb[20].mxu1 }
 0xeca   :  { %2274 = vrot.lane.b32.xlu0 %v2191_v27, %s2889_s12  ;;  %v2642_v30 = vpop.f32.mrb[21].mxu1 }
 0xecd   :  { %v2268_v10 = vpop.f32.mrb[30].mxu0 }
 0xece   :  { %2276 = vrot.lane.b32.xlu1 %v2268_v10, %s2889_s12  ;;  %v2647_v11 = vpop.f32.mrb[31].mxu0 }
 0xf3c   :  { %v2275_v13 = vpop.permute.xlu0 %2274 }
 0xf3d   :  { %2281 = vst.msk [vmem:[#allocation2] sm:$0xff] %vm2280_vm8, %v2275_v13 }
 0xf40   :  { %v2277_v15 = vpop.permute.xlu1 %2276 }
 0xf41   :  { %2282 = vst.msk [vmem:[#allocation2 + $0x8] sm:$0xff] %vm2280_vm8, %v2277_v15 }
 0xf44   :  { %v2283_v16 = vld [vmem:[#allocation2] sm:$0xff] }
 0xf45   :  { %2672 = vmatprep.mubr.msk.f32.mxu1 %vm2304_vm9, %v2283_v16 }
 0xf48   :  { %v2284_v17 = vld [vmem:[#allocation2 + $0x8] sm:$0xff] }
 0xf49   :  { %2673 = vmatmul.mubr.msk.f32.vlgmr.msra.gmra.mrb[22].mxu1 %vm2304_vm9, %v2284_v17 }
0x101c   :  { %v2674_v18 = vpop.f32.mrb[22].mxu1 }
0x101d   :  { %v2383_v19 = vadd.f32 %v2674_v18, %v2446_v45  ;;  %v2377_v20 = vpop.f32.mrb[23].mxu1 }
0x101e   :  { %v2378_v21 = vadd.f32 %v2446_v45, %v2377_v20 }
0x101f   :  { %2387 = vst [vmem:[#allocation9 + $0x8] sm:$0xff] %v2383_v19 }
0x1020   :  { %2386 = vst [vmem:[#allocation9] sm:$0xff] %v2378_v21 }
0x1021   :  { %2857 = shalt.err (!%p2854_p0)
}
0x1022   :  { %s2858_s4 = scalar_lea.hbm %s3257_s5, 256 }
0x1023   :  { %p2859_p1 = scmp.ne.s32.totalorder %s3257_s5, %s2858_s4  ;;  %p2862_p2 = scmp.lt.u32.totalorder %s2858_s4, %s3257_s5 }
0x1025   :  { %p2864_p3 = pnand %p2862_p2, %p2859_p1 }
0x1027   :  { %2867 = shalt.err (!%p2864_p3)
}
0x1028   :  { %2399 = dma.vmem_to_hbm [thread:$0]  %s2394_s16, 256, %s3257_s5, [#allocation5], %s2878_s1, %s2878_s1, %s2879_s17  }
0x1029   :  { %2872 = dma.done.wait [#allocation5], 256  }
0x102a   :  { %2873 = vsyncadd [#allocation5], 4294967040 }
0x102b   :  { %2403 = vsyncpa [#allocation4], 1 }
0x102c   :  { %2404 = vsyncpa [#allocation7], 1 }
0x102d   :  { %2405 = vsyncpa [#allocation5], 1 }

</bundles_post_ra>
